<compile_context>
chip_gen: v5e
topology: v5e:2x2
jax: 0.10.0
libtpu: 0.0.40
codegen_flags: <defaults>
</compile_context>

<pallas_src>
import functools

import jax
import jax.numpy as jnp
from jax.experimental import pallas as pl
from jax.experimental.pallas import tpu as pltpu


def _round_up(x, m):
    return ((x + m - 1) // m) * m


def _focal_loss_kernel(alpha_ref, preds_ref, labels_ref, out_ref, *,
                       gamma, num_classes, total_rows, tile_rows, needs_mask):
    """One grid step: partial focal-loss sum over `tile_rows` rows.

    alpha_ref  : [C]      f32, SMEM
    preds_ref  : [C, TR]  lane-dense block (rows along the 128-lane axis)
    labels_ref : [1, TR]  int32
    out_ref    : [1, 1]   f32, SMEM (per-tile partial sum)
    """
    C = num_classes
    x = preds_ref[...].astype(jnp.float32)            # [C, TR] (cast after DMA)
    labels = labels_ref[...]                          # [1, TR] int32

    # class-axis max / sum-exp as unrolled elementwise ops over the C row slices
    rows = [x[c:c + 1, :] for c in range(C)]          # each [1, TR]
    m = rows[0]
    for c in range(1, C):
        m = jnp.maximum(m, rows[c])
    zs = [r - m for r in rows]                        # shifted logits
    es = [jnp.exp(z) for z in zs]                     # C exps total (softmax numerators)
    sum_e = es[0]
    for c in range(1, C):
        sum_e = sum_e + es[c]
    log_sum_e = jnp.log(sum_e)
    inv_sum_e = pl.reciprocal(sum_e, approx=True)     # cheap EUP op, replaces a 2nd exp

    # gather at the label index via a compare/select chain (no one-hot / iota over C)
    z_lab = zs[C - 1]
    e_lab = es[C - 1]
    a_lab = alpha_ref[C - 1]
    for c in range(C - 2, -1, -1):
        is_c = labels == c
        z_lab = jnp.where(is_c, zs[c], z_lab)
        e_lab = jnp.where(is_c, es[c], e_lab)
        a_lab = jnp.where(is_c, alpha_ref[c], a_lab)

    logpt = z_lab - log_sum_e                         # log_softmax at the label
    pt = e_lab * inv_sum_e                            # softmax at the label (no 2nd exp)

    one_m_pt = 1.0 - pt
    g = float(gamma)
    if g == int(g) and 0 <= int(g) <= 8:
        # integer gamma: repeated multiply instead of pow (no exp/log, no inf*0 hazard)
        focal = jnp.ones_like(one_m_pt)
        for _ in range(int(g)):
            focal = focal * one_m_pt
    else:
        focal = jnp.power(one_m_pt, jnp.float32(g))

    loss = -a_lab * focal * logpt                     # [1, TR]

    if needs_mask:  # zero out the zero-padded tail rows
        row_idx = (pl.program_id(0) * tile_rows
                   + jax.lax.broadcasted_iota(jnp.int32, loss.shape, 1))
        loss = jnp.where(row_idx < total_rows, loss, 0.0)

    out_ref[0, 0] = jnp.sum(loss)


def focal_loss(preds, labels, alpha_vec, gamma=2.0, tile_rows=32768):
    """preds: [..., C] float; labels: [...] int; alpha_vec: [C] float.
    Returns the scalar sum focal loss (size_average=False)."""
    C = preds.shape[-1]
    preds2d = preds.reshape(-1, C)                    # keep original dtype (DMA narrow)
    R = preds2d.shape[0]

    # lane-dense layout: [C, R] with rows on the 128-lane axis
    preds_cr = preds2d.T                              # [C, R]
    labels_row = labels.reshape(1, -1).astype(jnp.int32)

    tr = min(int(tile_rows), _round_up(R, 128))
    tr = max(128, _round_up(tr, 128))
    r_pad = _round_up(R, tr)
    num_tiles = r_pad // tr

    if r_pad != R:
        preds_cr = jnp.pad(preds_cr, ((0, 0), (0, r_pad - R)))
        labels_row = jnp.pad(labels_row, ((0, 0), (0, r_pad - R)))

    alpha = alpha_vec.reshape(C).astype(jnp.float32)

    kernel = functools.partial(
        _focal_loss_kernel,
        gamma=gamma, num_classes=C, total_rows=R, tile_rows=tr,
        needs_mask=(r_pad != R),
    )

    partials = pl.pallas_call(
        kernel,
        grid=(num_tiles,),
        in_specs=[
            pl.BlockSpec(memory_space=pltpu.MemorySpace.SMEM),      # alpha [C]
            pl.BlockSpec((C, tr), lambda i: (0, i)),                # preds [C, r_pad]
            pl.BlockSpec((1, tr), lambda i: (0, i)),                # labels [1, r_pad]
        ],
        out_specs=pl.BlockSpec((1, 1), lambda i: (i, 0),
                               memory_space=pltpu.MemorySpace.SMEM),
        out_shape=jax.ShapeDtypeStruct((num_tiles, 1), jnp.float32),
        compiler_params=pltpu.CompilerParams(
            dimension_semantics=("parallel",),        # row tiles are independent (v7x: 2 TCs)
        ),
    )(alpha, preds_cr, labels_row)

    # tiny final reduction over per-tile f32 partial sums
    return jnp.sum(partials)


def _reference_focal_loss(preds, labels, alpha_vec, gamma=2.0):
    c = preds.shape[-1]
    p = preds.reshape(-1, c).astype(jnp.float32)
    l = labels.reshape(-1).astype(jnp.int32)
    logsoft = jax.nn.log_softmax(p, axis=1)
    logpt = jnp.take_along_axis(logsoft, l[:, None], axis=1)[:, 0]
    pt = jnp.exp(logpt)
    a = alpha_vec[l]
    return jnp.sum(-a * (1.0 - pt) ** gamma * logpt)


if __name__ == "__main__":
    num_classes = 3
    alpha_const = 0.25
    gamma = 2.0

    # alpha = [alpha, 1-alpha, 1-alpha, ...] as in the module's __init__
    alpha_vec = jnp.concatenate(
        [jnp.array([alpha_const], jnp.float32),
         jnp.full((num_classes - 1,), 1.0 - alpha_const, jnp.float32)]
    )

    key = jax.random.PRNGKey(0)
    kp, kl = jax.random.split(key)

    # detection-style input [B, N, C] (small)
    B, N, C = 2, 8, num_classes
    preds = jax.random.normal(kp, (B, N, C), dtype=jnp.float32)
    labels = jax.random.randint(kl, (B, N), 0, C, dtype=jnp.int32)

    loss = jax.block_until_ready(focal_loss(preds, labels, alpha_vec, gamma=gamma))
    ref = _reference_focal_loss(preds, labels, alpha_vec, gamma=gamma)
    # tolerance is loose-ish because pt uses the EUP approx reciprocal
    assert jnp.allclose(loss, ref, rtol=1e-2, atol=1e-2), (loss, ref)

    # exercise the multi-tile + padded-tail path (3 tiles of 128 rows, R=300)
    kp2, kl2 = jax.random.split(jax.random.PRNGKey(0))
    B2, N2 = 2, 150
    preds2 = jax.random.normal(kp2, (B2, N2, C), dtype=jnp.float32)
    labels2 = jax.random.randint(kl2, (B2, N2), 0, C, dtype=jnp.int32)
    loss2 = jax.block_until_ready(
        focal_loss(preds2, labels2, alpha_vec, gamma=gamma, tile_rows=128))
    ref2 = _reference_focal_loss(preds2, labels2, alpha_vec, gamma=gamma)
    assert jnp.allclose(loss2, ref2, rtol=1e-2, atol=1e-2), (loss2, ref2)

    print("KERNEL_OK")
</pallas_src>

<mosaic_0001>
module attributes {stable_mosaic.version = 11 : i64} {
  func.func @_focal_loss_kernel(%arg0: i32, %arg1: memref<3xf32, #tpu.memory_space<smem>>, %arg2: memref<3x128xf32, #tpu.memory_space<vmem>>, %arg3: memref<1x128xi32, #tpu.memory_space<vmem>>, %arg4: memref<1x1xf32, #tpu.memory_space<smem>>) attributes {dimension_semantics = [#tpu.dimension_semantics<parallel>], iteration_bounds = array<i64: 1>, scalar_prefetch = 0 : i64, scratch_operands = 0 : i64, tpu.core_type = #tpu.core_type<tc>, window_params = [{transform_indices = @transform_0, window_bounds = array<i64: 3>}, {transform_indices = @transform_1, window_bounds = array<i64: 3, 128>}, {transform_indices = @transform_2, window_bounds = array<i64: 1, 128>}, {transform_indices = @transform_3, window_bounds = array<i64: 1, 1>}]} {
    %c0 = arith.constant 0 : index
    %c0_0 = arith.constant 0 : index
    %0 = vector.load %arg2[%c0, %c0_0] : memref<3x128xf32, #tpu.memory_space<vmem>>, vector<3x128xf32>
    %c0_1 = arith.constant 0 : index
    %c0_2 = arith.constant 0 : index
    %1 = vector.load %arg3[%c0_1, %c0_2] : memref<1x128xi32, #tpu.memory_space<vmem>>, vector<1x128xi32>
    %2 = vector.extract_strided_slice %0 {offsets = [0, 0], sizes = [1, 128], strides = [1, 1]} : vector<3x128xf32> to vector<1x128xf32>
    %3 = vector.extract_strided_slice %0 {offsets = [1, 0], sizes = [1, 128], strides = [1, 1]} : vector<3x128xf32> to vector<1x128xf32>
    %4 = vector.extract_strided_slice %0 {offsets = [2, 0], sizes = [1, 128], strides = [1, 1]} : vector<3x128xf32> to vector<1x128xf32>
    %5 = arith.maximumf %2, %3 : vector<1x128xf32>
    %6 = arith.maximumf %5, %4 : vector<1x128xf32>
    %7 = arith.subf %2, %6 : vector<1x128xf32>
    %8 = arith.subf %3, %6 : vector<1x128xf32>
    %9 = arith.subf %4, %6 : vector<1x128xf32>
    %10 = math.exp %7 : vector<1x128xf32>
    %11 = math.exp %8 : vector<1x128xf32>
    %12 = math.exp %9 : vector<1x128xf32>
    %13 = arith.addf %10, %11 : vector<1x128xf32>
    %14 = arith.addf %13, %12 : vector<1x128xf32>
    %15 = math.log %14 : vector<1x128xf32>
    %16 = tpu.reciprocal %14 {approx = true} : vector<1x128xf32> -> vector<1x128xf32>
    %c2 = arith.constant 2 : index
    %17 = memref.load %arg1[%c2] : memref<3xf32, #tpu.memory_space<smem>>
    %c1_i32 = arith.constant 1 : i32
    %18 = vector.broadcast %c1_i32 : i32 to vector<1x128xi32>
    %19 = arith.cmpi eq, %1, %18 : vector<1x128xi32>
    %20 = arith.select %19, %8, %9 : vector<1x128xi1>, vector<1x128xf32>
    %21 = arith.select %19, %11, %12 : vector<1x128xi1>, vector<1x128xf32>
    %c1 = arith.constant 1 : index
    %22 = memref.load %arg1[%c1] : memref<3xf32, #tpu.memory_space<smem>>
    %23 = vector.broadcast %22 : f32 to vector<1x128xf32>
    %24 = vector.broadcast %17 : f32 to vector<1x128xf32>
    %25 = arith.select %19, %23, %24 : vector<1x128xi1>, vector<1x128xf32>
    %c0_i32 = arith.constant 0 : i32
    %26 = vector.broadcast %c0_i32 : i32 to vector<1x128xi32>
    %27 = arith.cmpi eq, %1, %26 : vector<1x128xi32>
    %28 = arith.select %27, %7, %20 : vector<1x128xi1>, vector<1x128xf32>
    %29 = arith.select %27, %10, %21 : vector<1x128xi1>, vector<1x128xf32>
    %c0_3 = arith.constant 0 : index
    %30 = memref.load %arg1[%c0_3] : memref<3xf32, #tpu.memory_space<smem>>
    %31 = vector.broadcast %30 : f32 to vector<1x128xf32>
    %32 = arith.select %27, %31, %25 : vector<1x128xi1>, vector<1x128xf32>
    %33 = arith.subf %28, %15 : vector<1x128xf32>
    %34 = arith.mulf %29, %16 : vector<1x128xf32>
    %cst = arith.constant 1.000000e+00 : f32
    %35 = vector.broadcast %cst : f32 to vector<1x128xf32>
    %36 = arith.subf %35, %34 : vector<1x128xf32>
    %cst_4 = arith.constant 1.000000e+00 : f32
    %37 = vector.broadcast %cst_4 : f32 to vector<1x128xf32>
    %38 = arith.mulf %37, %36 : vector<1x128xf32>
    %39 = arith.mulf %38, %36 : vector<1x128xf32>
    %cst_5 = arith.constant 0.000000e+00 : f32
    %40 = vector.broadcast %cst_5 : f32 to vector<1x128xf32>
    %41 = arith.subf %40, %32 : vector<1x128xf32>
    %42 = arith.mulf %41, %39 : vector<1x128xf32>
    %43 = arith.mulf %42, %33 : vector<1x128xf32>
    %c128_i32 = arith.constant 128 : i32
    %44 = arith.muli %arg0, %c128_i32 : i32
    %45 = tpu.iota {dimensions = array<i32: 1>} : vector<1x128xi32>
    %46 = vector.broadcast %44 : i32 to vector<1x128xi32>
    %47 = arith.addi %46, %45 : vector<1x128xi32>
    %c16_i32 = arith.constant 16 : i32
    %48 = vector.broadcast %c16_i32 : i32 to vector<1x128xi32>
    %49 = arith.cmpi slt, %47, %48 : vector<1x128xi32>
    %cst_6 = arith.constant 0.000000e+00 : f32
    %50 = vector.broadcast %cst_6 : f32 to vector<1x128xf32>
    %51 = arith.select %49, %43, %50 : vector<1x128xi1>, vector<1x128xf32>
    %52 = vector.shape_cast %51 : vector<1x128xf32> to vector<1x1x128xf32>
    %cst_7 = arith.constant dense<0.000000e+00> : vector<1xf32>
    %53 = vector.multi_reduction <add>, %52, %cst_7 [1, 2] : vector<1x1x128xf32> to vector<1xf32>
    %54 = vector.shape_cast %53 : vector<1xf32> to vector<1x1x1xf32>
    %55 = vector.extract %54[0, 0, 0] : f32 from vector<1x1x1xf32>
    %c0_8 = arith.constant 0 : index
    %c0_9 = arith.constant 0 : index
    %56 = memref.load %arg4[%c0_8, %c0_9] : memref<1x1xf32, #tpu.memory_space<smem>>
    memref.store %55, %arg4[%c0_8, %c0_9] : memref<1x1xf32, #tpu.memory_space<smem>>
    return
  }
  func.func @transform_0(%arg0: i32) -> i32 {
    %c0_i32 = arith.constant 0 : i32
    %c0_i32_0 = arith.constant 0 : i32
    return %c0_i32 : i32
  }
  func.func @transform_1(%arg0: i32) -> (i32, i32) {
    %c0_i32 = arith.constant 0 : i32
    %c0_i32_0 = arith.constant 0 : i32
    return %c0_i32, %arg0 : i32, i32
  }
  func.func @transform_2(%arg0: i32) -> (i32, i32) {
    %c0_i32 = arith.constant 0 : i32
    %c0_i32_0 = arith.constant 0 : i32
    return %c0_i32, %arg0 : i32, i32
  }
  func.func @transform_3(%arg0: i32) -> (i32, i32) {
    %c0_i32 = arith.constant 0 : i32
    %c0_i32_0 = arith.constant 0 : i32
    return %arg0, %c0_i32 : i32, i32
  }
}

</mosaic_0001>

<bundles_post_ra>
// kernel: tpu_custom_call.1
= control target key start
LH: loop header
LB: loop body
LE: loop exit
PB: predicated region body
PF: predicated region fallthrough
CT: control target
= control target key end

     0   :  { %8 = vsyncpa [#allocation4], 0  ;;  %s258_s0 = inlined_call_operand.hbm [shape: f32[3], index: 0, kind: input, shape index: {}]   ;;  %s259_s1 = inlined_call_operand.hbm [shape: f32[3,128], index: 1, kind: input, shape index: {}]   ;;  %s260_s2 = inlined_call_operand.vmem [shape: s32[1,128], index: 2, kind: input, shape index: {}]   ;;  %s261_s3 = inlined_call_operand.hbm [shape: f32[1,1], index: 3, kind: output, shape index: {}]  }
   0x1   :  { %9 = vsyncpa [#allocation3], 0 }
   0x2   :  { %10 = vsyncpa [#allocation5], 0  ;;  %s16_s14 = sshll.u32 %s258_s0, 4  ;;  %s25_s17 = sshll.u32 %s259_s1, 4  ;;  %s17_s14 = int_to_ptr.hbm [resolvable:$true] %s16_s14  ;;  %s26_s17 = int_to_ptr.hbm [resolvable:$true] %s25_s17 }
   0x3   :  { %s223_s18 = smov [#allocation2]   ;;  %s224_s19 = smov [#allocation6]  }
   0x4   :  { %19 = dma.hbm_to_smem %s17_s14, 16, %s223_s18, [#allocation4]  }
   0x5   :  { %s27_s20 = sshll.u32 %s224_s19, 4  ;;  %s28_s20 = int_to_ptr.vmem [resolvable:$true] %s27_s20 }
   0x6   :  { %30 = dma.hbm_to_vmem [thread:$0]  %s26_s17, 64, %s28_s20, [#allocation3]  }
   0x7   :  { %217 = dma.done.wait [#allocation4], 16  }
   0x8   :  { %218 = vsyncadd [#allocation4], 4294967280 }
   0x9   :  { %219 = dma.done.wait [#allocation3], 64  }
   0xa   :  { %220 = vsyncadd [#allocation3], 4294967232 }
   0xb   :  { %41 = sfence }
   0xc   :  { %v42_v0 = vld [vmem:[#allocation6] sm:$0x7]  ;;  %s152_s0 = sld [smem:[#allocation2 + $0x2]]  ;;  %v43_v23 = vld [vmem:[%s260_s2] sm:$0x1]  ;;  %v116_v35 = vlaneseq  ;;  %vm122_vm3 = vcmask 1040384  }
   0xd   :  { %v45_v1 = vrot.slane %v42_v0, 1  ;;  %v48_v2 = vrot.slane %v42_v0, 2  ;;  %s153_s1 = sld [smem:[#allocation2 + $0x1]]  ;;  %vm77_vm0 = vcmp.eq.s32.totalorder %v43_v23, 1  ;;  %vm102_vm1 = vcmp.eq.s32.totalorder %v43_v23, 0  ;;  %s140_s25 = sshll.u32 %s261_s3, 4  ;;  %s141_s25 = int_to_ptr.hbm [resolvable:$true] %s140_s25 }
   0xe   :  { %s105_s21 = sld [smem:[#allocation2]]  ;;  %v117_v41 = vand.u32 127, %v116_v35  ;;  %s225_s27 = smov [#allocation7]  }
   0xf   :  { %v47_v3 = vmax.f32 %v42_v0, %v45_v1 }
  0x10   :  { %vm120_vm2 = vcmp.lt.s32.totalorder %v117_v41, 16 }
  0x11   :  { %v50_v4 = vmax.f32 %v47_v3, %v48_v2 }
  0x12   :  { %v100_v25 = vstv %s152_s0 }
  0x13   :  { %v53_v5 = vrot.slane %v50_v4, 7  ;;  %v56_v7 = vrot.slane %v50_v4, 6  ;;  %v51_v8 = vsub.f32 %v42_v0, %v50_v4  ;;  %v99_v24 = vstv %s153_s1 }
  0x14   :  { %v101_v27 = vsel %vm77_vm0, %v99_v24, %v100_v25  ;;  %v106_v28 = vstv %s105_s21 }
  0x15   :  { %v55_v6 = vsub.f32 %v42_v0, %v53_v5  ;;  %v58_v9 = vsub.f32 %v42_v0, %v56_v7  ;;  %v59_v11 = vmul.f32 1.442695, %v51_v8  ;;  %v107_v34 = vsel %vm102_vm1, %v106_v28, %v101_v27 }
  0x16   :  { %v112_v40 = vsub.f32 0.0, %v107_v34 }
  0x17   :  { %79 = vst [vmem:[#allocation1] sm:$0xff] %v55_v6  ;;  %v61_v10 = vmul.f32 1.442695, %v55_v6  ;;  %v63_v12 = vmul.f32 1.442695, %v58_v9 }
  0x19   :  { %159 = vpow2.f32 %v61_v10 }
  0x1a   :  { %161 = vpow2.f32 %v59_v11 }
  0x1b   :  { %163 = vpow2.f32 %v63_v12 }
  0x1e   :  { %v81_v13 = vld [vmem:[#allocation1 + $0x1] ss:$9 sm:$0xff] }
  0x1f   :  { %84 = vst [vmem:[#allocation1] sm:$0xff] %v58_v9  ;;  %v160_v14 = vpop.eup %159 }
  0x20   :  { %v162_v15 = vpop.eup %161  ;;  %v66_v16 = vrot.slane %v160_v14, 1 }
  0x21   :  { %v164_v17 = vpop.eup %163 }
  0x22   :  { %v68_v19 = vadd.f32 %v162_v15, %v66_v16  ;;  %v70_v20 = vrot.slane %v164_v17, 2 }
  0x24   :  { %v72_v21 = vadd.f32 %v70_v20, %v68_v19 }
  0x26   :  { %v86_v18 = vld [vmem:[#allocation1 + $0x2] ss:$9 sm:$0xff]  ;;  %165 = vlog2.f32 %v72_v21 }
  0x27   :  { %89 = vst [vmem:[#allocation1] sm:$0xff] %v160_v14  ;;  %167 = vrcp.f32 %v72_v21  ;;  %v88_v31 = vsel %vm77_vm0, %v81_v13, %v86_v18 }
  0x28   :  { %v103_v38 = vsel %vm102_vm1, %v51_v8, %v88_v31 }
  0x2c   :  { %v166_v26 = vpop.eup %165 }
  0x2d   :  { %v168_v29 = vpop.eup %167  ;;  %v74_v36 = vmul.f32 0.6931472, %v166_v26 }
  0x2e   :  { %v91_v22 = vld [vmem:[#allocation1 + $0x1] ss:$9 sm:$0xff] }
  0x2f   :  { %93 = vst [vmem:[#allocation1] sm:$0xff] %v164_v17  ;;  %v108_v42 = vsub.f32 %v103_v38, %v74_v36 }
  0x36   :  { %v95_v30 = vld [vmem:[#allocation1 + $0x2] ss:$9 sm:$0xff] }
  0x37   :  { %v97_v32 = vsel %vm77_vm0, %v91_v22, %v95_v30 }
  0x38   :  { %v104_v33 = vsel %vm102_vm1, %v162_v15, %v97_v32 }
  0x39   :  { %v109_v37 = vmul.f32 %v168_v29, %v104_v33 }
  0x3b   :  { %v110_v39 = vsub.f32 1.0, %v109_v37 }
  0x3d   :  { %v111_v43 = vmul.f32 %v110_v39, %v110_v39 }
  0x3f   :  { %v113_v44 = vmul.f32 %v112_v40, %v111_v43 }
  0x41   :  { %v114_v45 = vmul.f32 %v113_v44, %v108_v42 }
  0x43   :  { %v121_v46 = vsel %vm120_vm2, %v114_v45, 0.0 }
  0x44   :  { %v123_v47 = vsel %vm122_vm3, %v121_v46, 0.0 }
  0x45   :  { %124 = vadd.xlane.f32.xlu0 %v123_v47 }
  0xb8   :  { %v125_v48 = vpop.xlane.xlu0 %124 }
  0xb9   :  { %v126_v49 = vrot.slane %v125_v48, 4 }
  0xbb   :  { %v127_v50 = vadd.f32 %v126_v49, %v125_v48 }
  0xbd   :  { %v128_v51 = vrot.slane %v127_v50, 2 }
  0xbf   :  { %v129_v52 = vadd.f32 %v128_v51, %v127_v50 }
  0xc1   :  { %v130_v53 = vrot.slane %v129_v52, 1 }
  0xc3   :  { %v131_v54 = vadd.f32 %v130_v53, %v129_v52 }
  0xc5   :  { %154 = vpush %v131_v54 }
  0xf6   :  { %s155_s26 = spop %154 }
  0xf7   :  { %134 = sst [smem:[#allocation7]] %s155_s26 }
  0xf8   :  { %143 = dma.smem_to_hbm %s225_s27, 16, %s141_s25, [#allocation5]  }
  0xf9   :  { %221 = dma.done.wait [#allocation5], 16  }
  0xfa   :  { %222 = vsyncadd [#allocation5], 4294967280 }
  0xfb   :  { %148 = sfence }
  0xfc   :  { %149 = vsyncpa [#allocation3], 1 }
  0xfd   :  { %150 = vsyncpa [#allocation4], 1 }
  0xfe   :  { %151 = vsyncpa [#allocation5], 1 }

</bundles_post_ra>
